<compile_context>
chip_gen: v7x
topology: tpu7x:2x2x1
jax: 0.10.0
libtpu: 0.0.40
codegen_flags: <defaults>
</compile_context>

<pallas_src>
import jax
import jax.numpy as jnp
from jax.experimental import pallas as pl
from jax.experimental.pallas import tpu as pltpu

IN_FEATURES = 784          # 28 * 28
OUT_FEATURES = 10
OUT_PADDED = 128           # lane-dense padded width for W^T / bias / MXU product
TB_MAX = 4096              # max batch tile (rows); 2 x 4096*784*4B = 25.7 MiB x-stream
VMEM_LIMIT_BYTES = 48 << 20  # explicit: above v5e/v6e scoped defaults, < v7x 64 MiB


def _linear_kernel(x_ref, wt_ref, b_ref, o_ref):
    # x_ref: (TB, 784), wt_ref: (784, 128) zero-padded W^T,
    # b_ref: (1, 128) zero-padded bias, o_ref: (TB, 10)
    acc = jnp.dot(x_ref[...], wt_ref[...], preferred_element_type=jnp.float32)
    # Keep the lane-dense (TB, 128) product in-kernel; store only the 10 real
    # columns (masked store is fine: the kernel is HBM-bound on the x stream).
    o_ref[...] = (acc + b_ref[...])[:, :OUT_FEATURES].astype(o_ref.dtype)


def prepare_linear_params(weight, bias):
    """One-time parameter prep (hoisted out of the forward path).

    weight: (10, 784) float32  (nn.Linear layout: out_features, in_features)
    bias:   (10,)     float32
    returns wt_padded (784, 128), b_padded (1, 128), zero-padded on lanes.
    """
    wt_padded = jnp.zeros((IN_FEATURES, OUT_PADDED), weight.dtype)
    wt_padded = wt_padded.at[:, :OUT_FEATURES].set(weight.T)
    b_padded = jnp.zeros((1, OUT_PADDED), bias.dtype)
    b_padded = b_padded.at[:, :OUT_FEATURES].set(bias)
    return wt_padded, b_padded


def _round_up(x, m):
    return ((x + m - 1) // m) * m


def _batch_tile(B):
    """Pick the batch tile.

    * Small B: one full-array block (always layout-legal).
    * B > 256: guarantee >= 2 grid steps (8-row aligned) so the 'parallel'
      batch axis can shard across both TensorCores on v7x, capped at TB_MAX
      so VMEM stays bounded for MNIST-scale B (e.g. 60000).
    """
    if B <= 256:
        return B
    return min(TB_MAX, _round_up((B + 1) // 2, 8))


def mnist_model_forward_flat(x2d, wt_padded, b_padded):
    """Forward pass of MnistModel on a pre-flattened input.

    x2d:       (B, 784) float32 (preferred: flatten once at data-load time)
    wt_padded: (784, 128) float32 (from prepare_linear_params)
    b_padded:  (1, 128)   float32
    returns    (B, 10)    float32
    """
    B = x2d.shape[0]
    tb = _batch_tile(B)
    grid = (pl.cdiv(B, tb),)

    cost = pl.CostEstimate(
        flops=2 * B * IN_FEATURES * OUT_PADDED,        # MXU does padded math
        transcendentals=0,
        bytes_accessed=4 * (B * IN_FEATURES            # x stream (dominant)
                            + IN_FEATURES * OUT_PADDED
                            + OUT_PADDED
                            + B * OUT_FEATURES),       # real output bytes
    )

    return pl.pallas_call(
        _linear_kernel,
        out_shape=jax.ShapeDtypeStruct((B, OUT_FEATURES), jnp.float32),
        grid_spec=pl.GridSpec(
            grid=grid,
            in_specs=[
                # x tiles stream along the batch axis (double-buffered).
                pl.BlockSpec((tb, IN_FEATURES), lambda i: (i, 0)),
                # W^T and bias: constant block index -> resident across iters.
                pl.BlockSpec((IN_FEATURES, OUT_PADDED), lambda i: (0, 0)),
                pl.BlockSpec((1, OUT_PADDED), lambda i: (0, 0)),
            ],
            # Direct (B, 10) output: no post-kernel slice pass.
            out_specs=pl.BlockSpec((tb, OUT_FEATURES), lambda i: (i, 0)),
        ),
        compiler_params=pltpu.CompilerParams(
            dimension_semantics=("parallel",),
            vmem_limit_bytes=VMEM_LIMIT_BYTES,
        ),
        cost_estimate=cost,
    )(x2d, wt_padded, b_padded)


def mnist_model_forward(xb, wt_padded, b_padded):
    """Forward pass of MnistModel, matching the PyTorch module's semantics.

    xb: any shape reshapeable to (-1, 784), e.g. (B, 1, 28, 28) float32.
    NOTE: for large NCHW batches prefer flattening once at data-load time and
    calling mnist_model_forward_flat directly — this reshape may be a physical
    relayout pass on TPU if XLA does not fuse it.
    """
    x2d = xb.reshape(-1, IN_FEATURES)
    return mnist_model_forward_flat(x2d, wt_padded, b_padded)


def _reference_forward(xb, weight, bias):
    x2d = xb.reshape(-1, IN_FEATURES)
    return x2d @ weight.T + bias


if __name__ == "__main__":
    key = jax.random.PRNGKey(0)
    k_x, k_w, k_b = jax.random.split(key, 3)

    B = 2
    xb = jax.random.normal(k_x, (B, 1, 28, 28), dtype=jnp.float32)

    # Deterministic init mimicking nn.Linear's uniform(-1/sqrt(fan_in), ...)
    bound = 1.0 / jnp.sqrt(784.0)
    weight = jax.random.uniform(k_w, (OUT_FEATURES, IN_FEATURES),
                                jnp.float32, -bound, bound)
    bias = jax.random.uniform(k_b, (OUT_FEATURES,), jnp.float32, -bound, bound)

    # One-time parameter prep (hoisted out of the forward path).
    wt_padded, b_padded = prepare_linear_params(weight, bias)
    wt_padded, b_padded = jax.block_until_ready((wt_padded, b_padded))

    out = mnist_model_forward(xb, wt_padded, b_padded)
    out = jax.block_until_ready(out)

    ref = _reference_forward(xb, weight, bias)
    assert out.shape == (B, OUT_FEATURES)
    assert jnp.allclose(out, ref, atol=1e-4, rtol=1e-4), "mismatch vs reference"

    print("KERNEL_OK")
</pallas_src>

<mosaic_0001>
module attributes {stable_mosaic.version = 11 : i64} {
  func.func @_linear_kernel(%arg0: i32, %arg1: memref<2x784xf32, #tpu.memory_space<vmem>>, %arg2: memref<784x128xf32, #tpu.memory_space<vmem>>, %arg3: memref<1x128xf32, #tpu.memory_space<vmem>>, %arg4: memref<2x10xf32, #tpu.memory_space<vmem>>) attributes {dimension_semantics = [#tpu.dimension_semantics<parallel>], iteration_bounds = array<i64: 1>, scalar_prefetch = 0 : i64, scratch_operands = 0 : i64, tpu.core_type = #tpu.core_type<tc>, window_params = [{transform_indices = @transform_0, window_bounds = array<i64: 2, 784>}, {pipeline_mode = #tpu.pipeline_mode<synchronous>, transform_indices = @transform_1, window_bounds = array<i64: 784, 128>}, {pipeline_mode = #tpu.pipeline_mode<synchronous>, transform_indices = @transform_2, window_bounds = array<i64: 1, 128>}, {transform_indices = @transform_3, window_bounds = array<i64: 2, 10>}]} {
    %c0 = arith.constant 0 : index
    %c0_0 = arith.constant 0 : index
    %0 = vector.load %arg1[%c0, %c0_0] : memref<2x784xf32, #tpu.memory_space<vmem>>, vector<2x784xf32>
    %c0_1 = arith.constant 0 : index
    %c0_2 = arith.constant 0 : index
    %1 = vector.load %arg2[%c0_1, %c0_2] : memref<784x128xf32, #tpu.memory_space<vmem>>, vector<784x128xf32>
    %cst = arith.constant dense<0.000000e+00> : vector<2x128xf32>
    %2 = tpu.matmul %0, %1, %cst {dimension_numbers = #tpu.dot_dimension_numbers<[1], [0], [0], [1], [0, 0, 1, 1], [], []>} : vector<2x784xf32>, vector<784x128xf32>, vector<2x128xf32> -> vector<2x128xf32>
    %c0_3 = arith.constant 0 : index
    %c0_4 = arith.constant 0 : index
    %3 = vector.load %arg3[%c0_3, %c0_4] : memref<1x128xf32, #tpu.memory_space<vmem>>, vector<1x128xf32>
    %4 = vector.broadcast %3 : vector<1x128xf32> to vector<2x128xf32>
    %5 = arith.addf %2, %4 : vector<2x128xf32>
    %6 = vector.extract_strided_slice %5 {offsets = [0, 0], sizes = [2, 10], strides = [1, 1]} : vector<2x128xf32> to vector<2x10xf32>
    %c0_5 = arith.constant 0 : index
    %c0_6 = arith.constant 0 : index
    %7 = vector.load %arg4[%c0_5, %c0_6] : memref<2x10xf32, #tpu.memory_space<vmem>>, vector<2x10xf32>
    tpu.vector_store %arg4[%c0_5, %c0_6], %6 {strides = array<i32>} : memref<2x10xf32, #tpu.memory_space<vmem>>, vector<2x10xf32>,
    return
  }
  func.func @transform_0(%arg0: i32) -> (i32, i32) {
    %c0_i32 = arith.constant 0 : i32
    %c0_i32_0 = arith.constant 0 : i32
    return %arg0, %c0_i32 : i32, i32
  }
  func.func @transform_1(%arg0: i32) -> (i32, i32) {
    %c0_i32 = arith.constant 0 : i32
    %c0_i32_0 = arith.constant 0 : i32
    %c0_i32_1 = arith.constant 0 : i32
    return %c0_i32, %c0_i32_0 : i32, i32
  }
  func.func @transform_2(%arg0: i32) -> (i32, i32) {
    %c0_i32 = arith.constant 0 : i32
    %c0_i32_0 = arith.constant 0 : i32
    %c0_i32_1 = arith.constant 0 : i32
    return %c0_i32, %c0_i32_0 : i32, i32
  }
  func.func @transform_3(%arg0: i32) -> (i32, i32) {
    %c0_i32 = arith.constant 0 : i32
    %c0_i32_0 = arith.constant 0 : i32
    return %arg0, %c0_i32 : i32, i32
  }
}

</mosaic_0001>

<bundles_post_ra>
// kernel: tpu_custom_call.1
= control target key start
LH: loop header
LB: loop body
LE: loop exit
PB: predicated region body
PF: predicated region fallthrough
CT: control target
= control target key end

     0   :  { %8 = vsyncpa [#allocation3], 0  ;;  %s875_s0 = inlined_call_operand.hbm [shape: f32[2,784], index: 0, kind: input, shape index: {}]   ;;  %s876_s1 = inlined_call_operand.hbm [shape: f32[784,128], index: 1, kind: input, shape index: {}]   ;;  %s877_s2 = inlined_call_operand.vmem [shape: f32[1,128], index: 2, kind: input, shape index: {}]   ;;  %s878_s3 = inlined_call_operand.hbm [shape: f32[2,10], index: 3, kind: output, shape index: {}]  }
   0x1   :  { %9 = vsyncpa [#allocation6], 0 }
   0x2   :  { %10 = vsyncpa [#allocation4], 0  ;;  %s789_s12 = smov [#allocation2]   ;;  %s790_s14 = smov [#allocation5]  }
   0x3   :  { %s17_s13 = sshll.u32 %s789_s12, 4  ;;  %s26_s15 = sshll.u32 %s790_s14, 4  ;;  %s18_s13 = int_to_ptr.vmem [resolvable:$true] %s17_s13  ;;  %s818_s15 = int_to_ptr.vmem [resolvable:$true] %s26_s15 }
   0x4   :  { %s717_s18 = scalar_lea.hbm %s875_s0, 224 }
   0x5   :  { %p718_p0 = scmp.ne.s32.totalorder %s875_s0, %s717_s18  ;;  %p721_p1 = scmp.lt.u32.totalorder %s717_s18, %s875_s0 }
   0x7   :  { %p723_p2 = pnand %p721_p1, %p718_p0 }
   0x9   :  { %726 = shalt.err (!%p723_p2)
}
   0xa   :  { %s727_s23 = scalar_lea.vmem %s18_s13, 224  ;;  %p732_p4 = scmp.lt.s32.totalorder %s18_s13, %s18_s13 }
   0xb   :  { %p728_p3 = scmp.ne.s32.totalorder %s18_s13, %s727_s23  ;;  %p733_p5 = scmp.lt.s32.totalorder %s727_s23, %s727_s23 }
   0xd   :  { %p734_p6 = por %p733_p5, %p732_p4 }
   0xf   :  { %p735_p7 = pnand %p734_p6, %p728_p3 }
  0x11   :  { %738 = shalt.err (!%p735_p7)
}
  0x12   :  { %20 = dma.hbm_to_vmem [thread:$0]  %s875_s0, 224, %s18_s13, [#allocation3]  }
  0x13   :  { %s739_s28 = scalar_lea.hbm %s876_s1, 12544 }
  0x14   :  { %p740_p8 = scmp.ne.s32.totalorder %s876_s1, %s739_s28  ;;  %p743_p9 = scmp.lt.u32.totalorder %s739_s28, %s876_s1 }
  0x16   :  { %p745_p10 = pnand %p743_p9, %p740_p8 }
  0x18   :  { %748 = shalt.err (!%p745_p10)
}
  0x19   :  { %s749_s6 = scalar_lea.vmem %s818_s15, 12544  ;;  %p754_p12 = scmp.lt.s32.totalorder %s818_s15, %s818_s15 }
  0x1a   :  { %p750_p11 = scmp.ne.s32.totalorder %s818_s15, %s749_s6  ;;  %p755_p13 = scmp.lt.s32.totalorder %s749_s6, %s749_s6 }
  0x1c   :  { %p756_p0 = por %p755_p13, %p754_p12 }
  0x1e   :  { %p757_p1 = pnand %p756_p0, %p750_p11 }
  0x20   :  { %760 = shalt.err (!%p757_p1)
}
  0x21   :  { %s791_s0 = smov 128   ;;  %s792_s7 = smov 8  }
  0x22   :  { %32 = dma.hbm_to_vmem [thread:$0]  %s876_s1, 12544, %s818_s15, [#allocation6], %s791_s0, %s791_s0, %s792_s7  }
  0x23   :  { %783 = dma.done.wait [#allocation3], 224  }
  0x24   :  { %784 = vsyncadd [#allocation3], 4294967072 }
  0x25   :  { %785 = dma.done.wait [#allocation6], 12544  }
  0x26   :  { %786 = vsyncadd [#allocation6], 4294954752  ;;  %v59_v0 = vld [vmem:[#allocation5 + $0x80] sm:$0xff]  ;;  %v60_v1 = vld [vmem:[#allocation5 + $0x88] sm:$0xff]  ;;  %v793_v43 = vmov 1983009808   ;;  %v154_v45 = vlaneseq }
  0x27   :  { %v43_v2 = vld [vmem:[#allocation5] sm:$0xff]  ;;  %v607_v3 = vpack.c.bf16 %v60_v1, %v59_v0  ;;  %v44_v4 = vld [vmem:[#allocation5 + $0x8] sm:$0xff]  ;;  %v61_v11 = vld [vmem:[#allocation5 + $0x90] sm:$0xff]  ;;  %v152_v44 = vunpack.c.l.s4 %v793_v43  ;;  %vm795_vm0 = vmmov 0   ;;  %vm189_vm1 = vcmask 130048   ;;  %s797_s11 = smov [#allocation7]  }
  0x28   :  { %v91_v5 = vld [vmem:[#allocation5 + $0x180] sm:$0xff]  ;;  %v92_v6 = vld [vmem:[#allocation5 + $0x188] sm:$0xff]  ;;  %v609_v7 = vpack.c.bf16 %v44_v4, %v43_v2  ;;  %v62_v13 = vld [vmem:[#allocation5 + $0x98] sm:$0xff]  ;;  %v155_v60 = vshrl.u32 %v154_v45, 7  ;;  %s480_s12 = sshll.u32 %s797_s11, 4  ;;  %vm472_vm2 = vcmask 74752   ;;  %s481_s12 = int_to_ptr.vmem [resolvable:$true] %s480_s12 }
  0x29   :  { %v639_v8 = vpack.c.bf16 %v92_v6, %v91_v5  ;;  %v75_v9 = vld [vmem:[#allocation5 + $0x100] sm:$0xff]  ;;  %v76_v10 = vld [vmem:[#allocation5 + $0x108] sm:$0xff]  ;;  %608 = vmatprep.subr.bf16.mxu0 %v607_v3  ;;  %v45_v14 = vld [vmem:[#allocation5 + $0x10] sm:$0xff]  ;;  %v611_v16 = vpack.c.bf16 %v62_v13, %v61_v11  ;;  %v153_v59 = vunpack.c.0.s8 %v152_v44  ;;  %p766_p3 = scmp.lt.s32.totalorder %s481_s12, %s481_s12 }
  0x2a   :  { %v641_v12 = vpack.c.bf16 %v76_v10, %v75_v9  ;;  %v46_v15 = vld [vmem:[#allocation5 + $0x18] sm:$0xff]  ;;  %610 = vmatpush3.bf16.msra.mxu0 %v609_v7  ;;  %v93_v18 = vld [vmem:[#allocation5 + $0x190] sm:$0xff]  ;;  %v63_v23 = vld [vmem:[#allocation5 + $0xa0] sm:$0xff] }
  0x2b   :  { %640 = vmatprep.subr.bf16.mxu1 %v639_v8  ;;  %v613_v17 = vpack.c.bf16 %v46_v15, %v45_v14  ;;  %v94_v19 = vld [vmem:[#allocation5 + $0x198] sm:$0xff]  ;;  %v77_v20 = vld [vmem:[#allocation5 + $0x110] sm:$0xff]  ;;  %v64_v24 = vld [vmem:[#allocation5 + $0xa8] sm:$0xff]  ;;  %612 = vmatprep.subr.bf16.mxu0 %v611_v16  ;;  %v849_v10 = vsub.s32 %v153_v59, %v155_v60 }
  0x2c   :  { %642 = vmatpush3.bf16.msra.mxu1 %v641_v12  ;;  %v643_v21 = vpack.c.bf16 %v94_v19, %v93_v18  ;;  %v78_v22 = vld [vmem:[#allocation5 + $0x118] sm:$0xff]  ;;  %v615_v26 = vpack.c.bf16 %v64_v24, %v63_v23  ;;  %v47_v27 = vld [vmem:[#allocation5 + $0x20] sm:$0xff]  ;;  %v48_v28 = vld [vmem:[#allocation5 + $0x28] sm:$0xff] }
  0x2d   :  { %v645_v25 = vpack.c.bf16 %v78_v22, %v77_v20  ;;  %v95_v29 = vld [vmem:[#allocation5 + $0x1a0] sm:$0xff]  ;;  %v96_v30 = vld [vmem:[#allocation5 + $0x1a8] sm:$0xff]  ;;  %v617_v33 = vpack.c.bf16 %v48_v28, %v47_v27  ;;  %v65_v35 = vld [vmem:[#allocation5 + $0xb0] sm:$0xff] }
  0x2e   :  { %644 = vmatprep.subr.bf16.mxu1 %v643_v21  ;;  %v79_v31 = vld [vmem:[#allocation5 + $0x120] sm:$0xff]  ;;  %v80_v32 = vld [vmem:[#allocation5 + $0x128] sm:$0xff]  ;;  %614 = vmatpush3.bf16.msra.mxu0 %v613_v17  ;;  %v647_v34 = vpack.c.bf16 %v96_v30, %v95_v29  ;;  %v66_v36 = vld [vmem:[#allocation5 + $0xb8] sm:$0xff] }
  0x2f   :  { %v49_v37 = vld [vmem:[#allocation5 + $0x30] sm:$0xff]  ;;  %616 = vmatprep.subr.bf16.mxu0 %v615_v26  ;;  %v649_v38 = vpack.c.bf16 %v80_v32, %v79_v31  ;;  %v619_v39 = vpack.c.bf16 %v66_v36, %v65_v35  ;;  %v50_v40 = vld [vmem:[#allocation5 + $0x38] sm:$0xff]  ;;  %v67_v49 = vld [vmem:[#allocation5 + $0xc0] sm:$0xff] }
  0x30   :  { %646 = vmatpush3.bf16.msra.mxu1 %v645_v25  ;;  %v97_v41 = vld [vmem:[#allocation5 + $0x1b0] sm:$0xff]  ;;  %v98_v42 = vld [vmem:[#allocation5 + $0x1b8] sm:$0xff]  ;;  %v68_v50 = vld [vmem:[#allocation5 + $0xc8] sm:$0xff]  ;;  %v621_v51 = vpack.c.bf16 %v50_v40, %v49_v37 }
  0x31   :  { %648 = vmatprep.subr.bf16.mxu1 %v647_v34  ;;  %v651_v46 = vpack.c.bf16 %v98_v42, %v97_v41  ;;  %v81_v47 = vld [vmem:[#allocation5 + $0x130] sm:$0xff]  ;;  %v82_v48 = vld [vmem:[#allocation5 + $0x138] sm:$0xff]  ;;  %v99_v52 = vld [vmem:[#allocation5 + $0x1c0] sm:$0xff]  ;;  %v623_v55 = vpack.c.bf16 %v68_v50, %v67_v49 }
  0x32   :  { %618 = vmatpush3.bf16.msra.mxu0 %v617_v33  ;;  %v100_v53 = vld [vmem:[#allocation5 + $0x1c8] sm:$0xff]  ;;  %v653_v54 = vpack.c.bf16 %v82_v48, %v81_v47  ;;  %v51_v56 = vld [vmem:[#allocation5 + $0x40] sm:$0xff]  ;;  %v69_v63 = vld [vmem:[#allocation5 + $0xd0] sm:$0xff] }
  0x33   :  { %620 = vmatprep.subr.bf16.mxu0 %v619_v39  ;;  %v52_v57 = vld [vmem:[#allocation5 + $0x48] sm:$0xff]  ;;  %v83_v58 = vld [vmem:[#allocation5 + $0x140] sm:$0xff]  ;;  %v655_v61 = vpack.c.bf16 %v100_v53, %v99_v52  ;;  %v70_v0 = vld [vmem:[#allocation5 + $0xd8] sm:$0xff] }
  0x34   :  { %650 = vmatpush3.bf16.msra.mxu1 %v649_v38  ;;  %v84_v62 = vld [vmem:[#allocation5 + $0x148] sm:$0xff]  ;;  %v101_v1 = vld [vmem:[#allocation5 + $0x1d0] sm:$0xff]  ;;  %v102_v2 = vld [vmem:[#allocation5 + $0x1d8] sm:$0xff]  ;;  %v625_v3 = vpack.c.bf16 %v52_v57, %v51_v56  ;;  %v627_v6 = vpack.c.bf16 %v70_v0, %v69_v63 }
  0x35   :  { %652 = vmatprep.subr.bf16.mxu1 %v651_v46  ;;  %v53_v4 = vld [vmem:[#allocation5 + $0x50] sm:$0xff]  ;;  %v657_v5 = vpack.c.bf16 %v84_v62, %v83_v58  ;;  %v54_v7 = vld [vmem:[#allocation5 + $0x58] sm:$0xff]  ;;  %v659_v11 = vpack.c.bf16 %v102_v2, %v101_v1  ;;  %v71_v12 = vld [vmem:[#allocation5 + $0xe0] sm:$0xff]  ;;  %v794_v62 = vmov 0.0|0.0  }
  0x36   :  { %622 = vmatpush3.bf16.msra.mxu0 %v621_v51  ;;  %v85_v8 = vld [vmem:[#allocation5 + $0x150] sm:$0xff]  ;;  %v86_v9 = vld [vmem:[#allocation5 + $0x158] sm:$0xff]  ;;  %v72_v13 = vld [vmem:[#allocation5 + $0xe8] sm:$0xff]  ;;  %v629_v16 = vpack.c.bf16 %v54_v7, %v53_v4 }
  0x37   :  { %624 = vmatprep.subr.bf16.mxu0 %v623_v55  ;;  %v103_v14 = vld [vmem:[#allocation5 + $0x1e0] sm:$0xff]  ;;  %v104_v15 = vld [vmem:[#allocation5 + $0x1e8] sm:$0xff]  ;;  %v661_v17 = vpack.c.bf16 %v86_v9, %v85_v8  ;;  %v41_v18 = vld [vmem:[#allocation2] sm:$0xff]  ;;  %v631_v19 = vpack.c.bf16 %v72_v13, %v71_v12  ;;  %v796_v8 = vmov 0.0  }
  0x38   :  { %654 = vmatpush3.bf16.msra.mxu1 %v653_v54  ;;  %v55_v20 = vld [vmem:[#allocation5 + $0x60] sm:$0xff]  ;;  %v56_v21 = vld [vmem:[#allocation5 + $0x68] sm:$0xff]  ;;  %v157_v23 = vrot.slane %v41_v18, %v849_v10  ;;  %v150_v24 = vcombine.high %v41_v18, %v41_v18  ;;  %v663_v25 = vpack.c.bf16 %v104_v15, %v103_v14  ;;  %v73_v27 = vld [vmem:[#allocation5 + $0xf0] sm:$0xff] }
  0x39   :  { %656 = vmatprep.subr.bf16.mxu1 %v655_v61  ;;  %v87_v22 = vld [vmem:[#allocation5 + $0x160] sm:$0xff]  ;;  %v88_v26 = vld [vmem:[#allocation5 + $0x168] sm:$0xff]  ;;  %v74_v28 = vld [vmem:[#allocation5 + $0xf8] sm:$0xff]  ;;  %v633_v33 = vpack.c.bf16 %v56_v21, %v55_v20 }
  0x3a   :  { %626 = vmatpush3.bf16.msra.mxu0 %v625_v3  ;;  %v105_v29 = vld [vmem:[#allocation5 + $0x1f0] sm:$0xff]  ;;  %v106_v30 = vld [vmem:[#allocation5 + $0x1f8] sm:$0xff]  ;;  %v165_v31 = vcombine.high %v157_v23, %v157_v23  ;;  %v164_v32 = vrot.slane %v150_v24, %v849_v10  ;;  %v665_v34 = vpack.c.bf16 %v88_v26, %v87_v22  ;;  %v635_v35 = vpack.c.bf16 %v74_v28, %v73_v27  ;;  %v123_v42 = vld [vmem:[#allocation5 + $0x280] sm:$0xff] }
  0x3b   :  { %628 = vmatprep.subr.bf16.mxu0 %v627_v6  ;;  %v57_v36 = vld [vmem:[#allocation5 + $0x70] sm:$0xff]  ;;  %v58_v37 = vld [vmem:[#allocation5 + $0x78] sm:$0xff]  ;;  %v667_v40 = vpack.c.bf16 %v106_v30, %v105_v29  ;;  %v124_v43 = vld [vmem:[#allocation5 + $0x288] sm:$0xff] }
  0x3c   :  { %658 = vmatpush3.bf16.msra.mxu1 %v657_v5  ;;  %v89_v38 = vld [vmem:[#allocation5 + $0x170] sm:$0xff]  ;;  %v166_v39 = vcombine.high %v164_v32, %v164_v32  ;;  %256 = vmatprep.mubr.f32.mxu0 %v165_v31  ;;  %v90_v41 = vld [vmem:[#allocation5 + $0x178] sm:$0xff]  ;;  %v637_v44 = vpack.c.bf16 %v58_v37, %v57_v36  ;;  %v671_v46 = vpack.c.bf16 %v124_v43, %v123_v42  ;;  %v107_v47 = vld [vmem:[#allocation5 + $0x200] sm:$0xff] }
  0x3d   :  { %660 = vmatprep.subr.bf16.mxu1 %v659_v11  ;;  %v669_v45 = vpack.c.bf16 %v90_v41, %v89_v38  ;;  %v108_v48 = vld [vmem:[#allocation5 + $0x208] sm:$0xff]  ;;  %v125_v49 = vld [vmem:[#allocation5 + $0x290] sm:$0xff]  ;;  %v126_v50 = vld [vmem:[#allocation5 + $0x298] sm:$0xff] }
  0x3e   :  { %630 = vmatpush3.bf16.msra.mxu0 %v629_v16  ;;  %326 = vmatprep.mubr.f32.mxu1 %v166_v39  ;;  %v673_v51 = vpack.c.bf16 %v108_v48, %v107_v47  ;;  %v42_v52 = vld [vmem:[#allocation2 + $0x8] sm:$0x3f]  ;;  %v139_v53 = vld [vmem:[#allocation5 + $0x300] sm:$0xff]  ;;  %v675_v54 = vpack.c.bf16 %v126_v50, %v125_v49  ;;  %v109_v55 = vld [vmem:[#allocation5 + $0x210] sm:$0xff] }
  0x3f   :  { %632 = vmatprep.subr.bf16.mxu0 %v631_v19  ;;  %v110_v56 = vld [vmem:[#allocation5 + $0x218] sm:$0xff]  ;;  %v167_v57 = vcombine.high %v42_v52, %v42_v52  ;;  %v854_v58 = vrot.slane %v42_v52, %v849_v10  ;;  %v140_v59 = vld [vmem:[#allocation5 + $0x308] sm:$0xff]  ;;  %v127_v60 = vld [vmem:[#allocation5 + $0x2a0] sm:$0xff] }
  0x40   :  { %662 = vmatpush3.bf16.msra.mxu1 %v661_v17  ;;  %v128_v61 = vld [vmem:[#allocation5 + $0x2a8] sm:$0xff]  ;;  %v704_v63 = vpack.c.bf16 %v140_v59, %v139_v53  ;;  %v677_v1 = vpack.c.bf16 %v110_v56, %v109_v55  ;;  %v111_v3 = vld [vmem:[#allocation5 + $0x220] sm:$0xff]  ;;  %v129_v6 = vld [vmem:[#allocation5 + $0x2b0] sm:$0xff] }
  0x41   :  { %664 = vmatprep.subr.bf16.mxu1 %v663_v25  ;;  %v182_v0 = vcombine.high %v854_v58, %v854_v58  ;;  %v679_v2 = vpack.c.bf16 %v128_v61, %v127_v60  ;;  %v112_v4 = vld [vmem:[#allocation5 + $0x228] sm:$0xff]  ;;  %v181_v5 = vrot.slane %v167_v57, %v849_v10  ;;  %v130_v7 = vld [vmem:[#allocation5 + $0x2b8] sm:$0xff]  ;;  %v113_v12 = vld [vmem:[#allocation5 + $0x230] sm:$0xff] }
  0x42   :  { %634 = vmatpush3.bf16.msra.mxu0 %v633_v33  ;;  %v681_v9 = vpack.c.bf16 %v112_v4, %v111_v3  ;;  %v683_v11 = vpack.c.bf16 %v130_v7, %v129_v6  ;;  %v114_v13 = vld [vmem:[#allocation5 + $0x238] sm:$0xff]  ;;  %v131_v14 = vld [vmem:[#allocation5 + $0x2c0] sm:$0xff]  ;;  %v132_v15 = vld [vmem:[#allocation5 + $0x2c8] sm:$0xff] }
  0x43   :  { %636 = vmatprep.subr.bf16.mxu0 %v635_v35  ;;  %v685_v16 = vpack.c.bf16 %v114_v13, %v113_v12  ;;  %v687_v10 = vpack.c.bf16 %v132_v15, %v131_v14  ;;  %v115_v17 = vld [vmem:[#allocation5 + $0x240] sm:$0xff]  ;;  %v116_v18 = vld [vmem:[#allocation5 + $0x248] sm:$0xff]  ;;  %v133_v19 = vld [vmem:[#allocation5 + $0x2d0] sm:$0xff] }
  0x44   :  { %666 = vmatpush3.bf16.msra.mxu1 %v665_v34  ;;  %v134_v20 = vld [vmem:[#allocation5 + $0x2d8] sm:$0xff]  ;;  %v689_v21 = vpack.c.bf16 %v116_v18, %v115_v17  ;;  %v135_v25 = vld [vmem:[#allocation5 + $0x2e0] sm:$0xff]  ;;  %v136_v26 = vld [vmem:[#allocation5 + $0x2e8] sm:$0xff] }
  0x45   :  { %668 = vmatprep.subr.bf16.mxu1 %v667_v40  ;;  %v691_v22 = vpack.c.bf16 %v134_v20, %v133_v19  ;;  %v118_v24 = vld [vmem:[#allocation5 + $0x258] sm:$0xff]  ;;  %v695_v28 = vpack.c.bf16 %v136_v26, %v135_v25  ;;  %v119_v29 = vld [vmem:[#allocation5 + $0x260] sm:$0xff]  ;;  %v120_v30 = vld [vmem:[#allocation5 + $0x268] sm:$0xff] }
  0x46   :  { %638 = vmatpush3.bf16.msra.mxu0 %v637_v44  ;;  %v137_v31 = vld [vmem:[#allocation5 + $0x2f0] sm:$0xff]  ;;  %v697_v33 = vpack.c.bf16 %v120_v30, %v119_v29  ;;  %v122_v36 = vld [vmem:[#allocation5 + $0x278] sm:$0xff] }
  0x47   :  { %672 = vmatprep.subr.bf16.mxu0 %v671_v46  ;;  %v121_v35 = vld [vmem:[#allocation5 + $0x270] sm:$0xff] }
  0x48   :  { %670 = vmatpush3.bf16.msra.mxu1 %v669_v45  ;;  %v701_v37 = vpack.c.bf16 %v122_v36, %v121_v35  ;;  %v490_v39 = vld [vmem:[%s877_s2] ss:$0 sm:$0xff]  ;;  %s761_s2 = scalar_lea.vmem %s481_s12, 32 }
  0x49   :  { %703 = vmatprep.subr.bf16.mxu1 %v794_v62  ;;  %257 = vmatmul.mubr.f32.vlgmr.msra.gmra.mrb[0].mxu0 %v157_v23  ;;  %v117_v23 = vld [vmem:[#allocation5 + $0x250] sm:$0xff]  ;;  %p762_p2 = scmp.ne.s32.totalorder %s481_s12, %s761_s2  ;;  %p767_p4 = scmp.lt.s32.totalorder %s761_s2, %s761_s2 }
  0x4a   :  { %674 = vmatpush3.bf16.msra.mxu0 %v673_v51  ;;  %396 = vmatprep.mubr.f32.mxu0 %v182_v0  ;;  %v693_v27 = vpack.c.bf16 %v118_v24, %v117_v23 }
  0x4b   :  { %327 = vmatmul.mubr.f32.vlgmr.msra.gmra.mrb[0].mxu1 %v164_v32  ;;  %676 = vmatprep.subr.bf16.mxu0 %v675_v54  ;;  %v138_v32 = vld [vmem:[#allocation5 + $0x2f8] sm:$0xff]  ;;  %p768_p5 = por %p767_p4, %p766_p3 }
  0x4c   :  { %705 = vmatpush3.bf16.msra.mxu1 %v704_v63  ;;  %604 = vmatprep.mubr.msk.f32.mxu1 %vm795_vm0, %v796_v8  ;;  %v699_v34 = vpack.c.bf16 %v138_v32, %v137_v31 }
  0x4d   :  { %p769_p6 = pnand %p768_p5, %p762_p2 }
  0x4e   :  { %678 = vmatpush3.bf16.msra.mxu0 %v677_v1 }
  0x4f   :  { %680 = vmatprep.subr.bf16.mxu0 %v679_v2  ;;  %605 = vmatmul.mubr.msk.f32.vlgmr.msra.gmra.mrb[2].mxu1 %vm189_vm1, %v181_v5 }
  0x52   :  { %682 = vmatpush3.bf16.msra.mxu0 %v681_v9 }
  0x53   :  { %684 = vmatprep.subr.bf16.mxu0 %v683_v11 }
  0x56   :  { %686 = vmatpush3.bf16.msra.mxu0 %v685_v16 }
  0x57   :  { %688 = vmatprep.subr.bf16.mxu0 %v687_v10 }
  0x5a   :  { %690 = vmatpush3.bf16.msra.mxu0 %v689_v21 }
  0x5b   :  { %692 = vmatprep.subr.bf16.mxu0 %v691_v22 }
  0x5e   :  { %694 = vmatpush3.bf16.msra.mxu0 %v693_v27 }
  0x5f   :  { %696 = vmatprep.subr.bf16.mxu0 %v695_v28 }
  0x62   :  { %698 = vmatpush3.bf16.msra.mxu0 %v697_v33 }
  0x63   :  { %700 = vmatprep.subr.bf16.mxu0 %v699_v34 }
  0x66   :  { %702 = vmatpush3.bf16.msra.mxu0 %v701_v37 }
  0x69   :  { %397 = vmatmul.mubr.f32.vlgmr.msra.gmra.mrb[2].mxu0 %v854_v58 }
 0x11c   :  { %v524_v38 = vpop.f32.mrb[0].mxu0 }
 0x11d   :  { %v525_v40 = vpop.f32.mrb[1].mxu0 }
 0x11e   :  { %v559_v41 = vpop.f32.mrb[0].mxu1  ;;  %v526_v42 = vadd.f32 %v525_v40, %v524_v38 }
 0x11f   :  { %v560_v43 = vpop.f32.mrb[1].mxu1 }
 0x120   :  { %v561_v44 = vadd.f32 %v560_v43, %v559_v41  ;;  %v259_v45 = vadd.f32 %v526_v42, %v490_v39 }
 0x122   :  { %v329_v46 = vadd.f32 %v561_v44, %v259_v45  ;;  %v468_v47 = vpop.f32.mrb[2].mxu1 }
 0x123   :  { %v606_v48 = vpop.f32.mrb[3].mxu1 }
 0x13c   :  { %v594_v49 = vpop.f32.mrb[2].mxu0 }
 0x13d   :  { %v595_v50 = vpop.f32.mrb[3].mxu0 }
 0x13e   :  { %v596_v51 = vadd.f32 %v595_v50, %v594_v49 }
 0x140   :  { %v399_v52 = vadd.f32 %v596_v51, %v329_v46 }
 0x142   :  { %v469_v53 = vadd.f32 %v468_v47, %v399_v52 }
 0x144   :  { %473 = vst.msk [vmem:[#allocation7] sm:$0x3] %vm472_vm2, %v469_v53 }
 0x145   :  { %772 = shalt.err (!%p769_p6)
}
 0x146   :  { %s773_s15 = scalar_lea.hbm %s878_s3, 32 }
 0x147   :  { %p774_p7 = scmp.ne.s32.totalorder %s878_s3, %s773_s15  ;;  %p777_p8 = scmp.lt.u32.totalorder %s773_s15, %s878_s3 }
 0x149   :  { %p779_p9 = pnand %p777_p8, %p774_p7 }
 0x14b   :  { %782 = shalt.err (!%p779_p9)
}
 0x14c   :  { %483 = dma.vmem_to_hbm [thread:$0]  %s481_s12, 32, %s878_s3, [#allocation4]  }
 0x14d   :  { %787 = dma.done.wait [#allocation4], 32  }
 0x14e   :  { %788 = vsyncadd [#allocation4], 4294967264 }
 0x14f   :  { %487 = vsyncpa [#allocation3], 1 }
 0x150   :  { %488 = vsyncpa [#allocation6], 1 }
 0x151   :  { %489 = vsyncpa [#allocation4], 1 }

</bundles_post_ra>
